<compile_context>
chip_gen: v7x
topology: tpu7x:2x2x1
jax: 0.10.0
libtpu: 0.0.40
codegen_flags: <defaults>
</compile_context>

<pallas_src>
import functools

import jax
import jax.numpy as jnp
from jax import lax
from jax.experimental import pallas as pl
from jax.experimental.pallas import tpu as pltpu  # noqa: F401  (TPU backend assumed)


def mha_kernel(x_ref, wqkv_ref, wproj_ref, b_ref, o_ref, *,
               num_heads, head_size, batch, seq_len):
    """Single invocation: full (B*T, C) activations + packed weights in VMEM."""
    H, D, B, T = num_heads, head_size, batch, seq_len
    scale = D ** -0.5

    x = x_ref[...]                                                 # (B*T, C) f32
    # One fused QKV projection for all heads: (B*T, C) @ (C, 3*H*D).
    qkv = jnp.dot(x, wqkv_ref[...], preferred_element_type=jnp.float32)

    # Causal mask (shared across batch and heads): keep where row >= col.
    rows = lax.broadcasted_iota(jnp.int32, (T, T), 0)
    cols = lax.broadcasted_iota(jnp.int32, (T, T), 1)
    causal = rows >= cols

    head_outs = []
    for h in range(H):  # static unroll (H=4); attention itself batched over B
        # Static lane slices out of the fused QKV result (free), then a
        # tile-aligned leading-dim split (B*T, D) -> (B, T, D).
        q = (qkv[:, h * D:(h + 1) * D] * scale).reshape(B, T, D)   # scale folded into q
        k = qkv[:, (H + h) * D:(H + h + 1) * D].reshape(B, T, D)
        v = qkv[:, (2 * H + h) * D:(2 * H + h + 1) * D].reshape(B, T, D)

        # Batched scores over B, contracting last dims (no explicit k.T).
        s = jnp.einsum('bqd,bkd->bqk', q, k,
                       preferred_element_type=jnp.float32)         # (B, T, T)
        s = jnp.where(causal, s, -jnp.inf)
        s = s - jnp.max(s, axis=-1, keepdims=True)
        p = jnp.exp(s)
        p = p * pl.reciprocal(jnp.sum(p, axis=-1, keepdims=True), approx=True)

        head_outs.append(jnp.einsum('bqk,bkd->bqd', p, v,
                                    preferred_element_type=jnp.float32))  # (B, T, D)

    # Lane-concat over heads, then ONE output projection for all heads.
    attn = jnp.concatenate(head_outs, axis=-1).reshape(B * T, H * D)
    out = jnp.dot(attn, wproj_ref[...], preferred_element_type=jnp.float32)  # (B*T, C)
    o_ref[...] = (out + b_ref[...]).astype(o_ref.dtype)
    # NOTE: at production T, replace the full (T,T) score materialization with
    # flash-style KV tiling (online softmax) — required before scaling on v7x
    # (64 MiB VMEM).  Output last-dim is C=32 (<128): the single 2 KiB masked
    # store here is noise; at real sizes present a >=128-lane output slab.
    # TODO(synk): training-mode dropout not implemented (eval-mode identity).


def multi_head_attention(x, wq, wk, wv, wproj, bproj, *, num_heads, head_size):
    """x: (B, T, C); wq/wk/wv: (H, C, D); wproj: (H, D, C); bproj: (C,)."""
    B, T, C = x.shape
    H, _, D = wq.shape

    def flatten_heads(w):  # (H, C, D) -> (C, H*D), column index = h*D + d
        return jnp.transpose(w, (1, 0, 2)).reshape(C, H * D)

    # Packed weights: [ Q(all heads) | K(all heads) | V(all heads) ] -> (C, 3*H*D)
    wqkv = jnp.concatenate(
        [flatten_heads(wq), flatten_heads(wk), flatten_heads(wv)], axis=-1)
    wproj_flat = wproj.reshape(H * D, C)   # matches concat-over-heads row ordering
    bias2d = bproj.reshape(1, C)
    x2d = x.reshape(B * T, C)

    kernel = functools.partial(mha_kernel, num_heads=H, head_size=D,
                               batch=B, seq_len=T)

    out2d = pl.pallas_call(
        kernel,
        out_shape=jax.ShapeDtypeStruct((B * T, C), x.dtype),
        # No grid: single kernel invocation, all operands resident in VMEM.
    )(x2d, wqkv, wproj_flat, bias2d)
    return out2d.reshape(B, T, C)


def reference_mha(x, wq, wk, wv, wproj, bproj, head_size):
    """Pure-JAX reference mirroring the PyTorch module (eval mode)."""
    B, T, C = x.shape
    outs = []
    for h in range(wq.shape[0]):
        q = x @ wq[h]
        k = x @ wk[h]
        v = x @ wv[h]
        wei = (q @ jnp.swapaxes(k, -2, -1)) * head_size ** -0.5
        mask = jnp.tril(jnp.ones((T, T), bool))
        wei = jnp.where(mask, wei, -jnp.inf)
        wei = jax.nn.softmax(wei, axis=-1)
        outs.append(wei @ v)
    cat = jnp.concatenate(outs, axis=-1)                      # (B, T, H*D)
    wp_flat = wproj.reshape(-1, C)                            # (H*D, C)
    return cat @ wp_flat + bproj


if __name__ == "__main__":
    # module hyperparameters (small, consistent with the forward pass)
    num_heads = 4
    head_size = 8
    n_embed = 32
    block_size = 8     # == T
    dropout = 0.0      # eval-mode: identity

    B, T, C, H, D = 2, block_size, n_embed, num_heads, head_size

    key = jax.random.PRNGKey(0)
    kx, kq, kk, kv, kp, kb = jax.random.split(key, 6)
    x = jax.random.normal(kx, (B, T, C), jnp.float32)
    wq = jax.random.normal(kq, (H, C, D), jnp.float32) * 0.1
    wk = jax.random.normal(kk, (H, C, D), jnp.float32) * 0.1
    wv = jax.random.normal(kv, (H, C, D), jnp.float32) * 0.1
    wproj = jax.random.normal(kp, (H, D, C), jnp.float32) * 0.1
    bproj = jax.random.normal(kb, (C,), jnp.float32) * 0.1

    out = multi_head_attention(x, wq, wk, wv, wproj, bproj,
                               num_heads=H, head_size=D)
    out = jax.block_until_ready(out)

    ref = reference_mha(x, wq, wk, wv, wproj, bproj, D)
    assert out.shape == (B, T, C)
    max_err = float(jnp.max(jnp.abs(out - ref)))
    # tolerance slightly relaxed vs 1e-4 because of the approx (EUP) reciprocal
    assert jnp.allclose(out, ref, atol=2e-3, rtol=2e-3), \
        f"mismatch vs reference (max abs err {max_err})"

    print("KERNEL_OK")
</pallas_src>

<mosaic_0001>
module attributes {stable_mosaic.version = 11 : i64} {
  func.func @mha_kernel(%arg0: memref<16x32xf32, #tpu.memory_space<vmem>>, %arg1: memref<32x96xf32, #tpu.memory_space<vmem>>, %arg2: memref<32x32xf32, #tpu.memory_space<vmem>>, %arg3: memref<1x32xf32, #tpu.memory_space<vmem>>, %arg4: memref<16x32xf32, #tpu.memory_space<vmem>>) attributes {dimension_semantics = [], scalar_prefetch = 0 : i64, scratch_operands = 0 : i64, tpu.core_type = #tpu.core_type<tc>} {
    %c0 = arith.constant 0 : index
    %c0_0 = arith.constant 0 : index
    %0 = vector.load %arg0[%c0, %c0_0] : memref<16x32xf32, #tpu.memory_space<vmem>>, vector<16x32xf32>
    %c0_1 = arith.constant 0 : index
    %c0_2 = arith.constant 0 : index
    %1 = vector.load %arg1[%c0_1, %c0_2] : memref<32x96xf32, #tpu.memory_space<vmem>>, vector<32x96xf32>
    %cst = arith.constant dense<0.000000e+00> : vector<16x96xf32>
    %2 = tpu.matmul %0, %1, %cst {dimension_numbers = #tpu.dot_dimension_numbers<[1], [0], [0], [1], [0, 0, 1, 1], [], []>} : vector<16x32xf32>, vector<32x96xf32>, vector<16x96xf32> -> vector<16x96xf32>
    %3 = tpu.iota {dimensions = array<i32: 0>} : vector<8x8xi32>
    %4 = tpu.iota {dimensions = array<i32: 1>} : vector<8x8xi32>
    %5 = arith.cmpi sge, %3, %4 : vector<8x8xi32>
    %6 = vector.extract_strided_slice %2 {offsets = [0, 0], sizes = [16, 8], strides = [1, 1]} : vector<16x96xf32> to vector<16x8xf32>
    %cst_3 = arith.constant 0.353553385 : f32
    %7 = vector.broadcast %cst_3 : f32 to vector<16x8xf32>
    %8 = arith.mulf %6, %7 : vector<16x8xf32>
    %9 = vector.shape_cast %8 : vector<16x8xf32> to vector<2x8x8xf32>
    %10 = vector.extract_strided_slice %2 {offsets = [0, 32], sizes = [16, 8], strides = [1, 1]} : vector<16x96xf32> to vector<16x8xf32>
    %11 = vector.shape_cast %10 : vector<16x8xf32> to vector<2x8x8xf32>
    %12 = vector.extract_strided_slice %2 {offsets = [0, 64], sizes = [16, 8], strides = [1, 1]} : vector<16x96xf32> to vector<16x8xf32>
    %13 = vector.shape_cast %12 : vector<16x8xf32> to vector<2x8x8xf32>
    "tpu.trace_start"() <{level = 10 : i32, message = "bqd,bkd->bqk"}> : () -> ()
    %cst_4 = arith.constant dense<0.000000e+00> : vector<2x8x8xf32>
    %14 = tpu.matmul %9, %11, %cst_4 {dimension_numbers = #tpu.dot_dimension_numbers<[2], [2], [1], [1], [0, 0, 0, 1, 1, 1], [0], [0]>} : vector<2x8x8xf32>, vector<2x8x8xf32>, vector<2x8x8xf32> -> vector<2x8x8xf32>
    %cst_5 = arith.constant 0xFF800000 : f32
    "tpu.trace_stop"() : () -> ()
    %15 = vector.shape_cast %5 : vector<8x8xi1> to vector<1x8x8xi1>
    %16 = vector.broadcast %15 : vector<1x8x8xi1> to vector<2x8x8xi1>
    %17 = vector.broadcast %cst_5 : f32 to vector<2x8x8xf32>
    %18 = arith.select %16, %14, %17 : vector<2x8x8xi1>, vector<2x8x8xf32>
    %cst_6 = arith.constant dense<0xFF800000> : vector<2x8xf32>
    %19 = vector.multi_reduction <maximumf>, %18, %cst_6 [2] : vector<2x8x8xf32> to vector<2x8xf32>
    %20 = vector.shape_cast %19 : vector<2x8xf32> to vector<2x8x1xf32>
    %21 = vector.broadcast %20 : vector<2x8x1xf32> to vector<2x8x8xf32>
    %22 = arith.subf %18, %21 : vector<2x8x8xf32>
    %23 = math.exp %22 : vector<2x8x8xf32>
    %cst_7 = arith.constant dense<0.000000e+00> : vector<2x8xf32>
    %24 = vector.multi_reduction <add>, %23, %cst_7 [2] : vector<2x8x8xf32> to vector<2x8xf32>
    %25 = vector.shape_cast %24 : vector<2x8xf32> to vector<2x8x1xf32>
    %26 = tpu.reciprocal %25 {approx = true} : vector<2x8x1xf32> -> vector<2x8x1xf32>
    %27 = vector.broadcast %26 : vector<2x8x1xf32> to vector<2x8x8xf32>
    %28 = arith.mulf %23, %27 : vector<2x8x8xf32>
    "tpu.trace_start"() <{level = 10 : i32, message = "bqk,bkd->bqd"}> : () -> ()
    %cst_8 = arith.constant dense<0.000000e+00> : vector<2x8x8xf32>
    %29 = tpu.matmul %28, %13, %cst_8 {dimension_numbers = #tpu.dot_dimension_numbers<[2], [1], [1], [2], [0, 0, 0, 1, 1, 2], [0], [0]>} : vector<2x8x8xf32>, vector<2x8x8xf32>, vector<2x8x8xf32> -> vector<2x8x8xf32>
    "tpu.trace_stop"() : () -> ()
    %30 = vector.extract_strided_slice %2 {offsets = [0, 8], sizes = [16, 8], strides = [1, 1]} : vector<16x96xf32> to vector<16x8xf32>
    %cst_9 = arith.constant 0.353553385 : f32
    %31 = vector.broadcast %cst_9 : f32 to vector<16x8xf32>
    %32 = arith.mulf %30, %31 : vector<16x8xf32>
    %33 = vector.shape_cast %32 : vector<16x8xf32> to vector<2x8x8xf32>
    %34 = vector.extract_strided_slice %2 {offsets = [0, 40], sizes = [16, 8], strides = [1, 1]} : vector<16x96xf32> to vector<16x8xf32>
    %35 = vector.shape_cast %34 : vector<16x8xf32> to vector<2x8x8xf32>
    %36 = vector.extract_strided_slice %2 {offsets = [0, 72], sizes = [16, 8], strides = [1, 1]} : vector<16x96xf32> to vector<16x8xf32>
    %37 = vector.shape_cast %36 : vector<16x8xf32> to vector<2x8x8xf32>
    "tpu.trace_start"() <{level = 10 : i32, message = "bqd,bkd->bqk"}> : () -> ()
    %cst_10 = arith.constant dense<0.000000e+00> : vector<2x8x8xf32>
    %38 = tpu.matmul %33, %35, %cst_10 {dimension_numbers = #tpu.dot_dimension_numbers<[2], [2], [1], [1], [0, 0, 0, 1, 1, 1], [0], [0]>} : vector<2x8x8xf32>, vector<2x8x8xf32>, vector<2x8x8xf32> -> vector<2x8x8xf32>
    %cst_11 = arith.constant 0xFF800000 : f32
    "tpu.trace_stop"() : () -> ()
    %39 = vector.shape_cast %5 : vector<8x8xi1> to vector<1x8x8xi1>
    %40 = vector.broadcast %39 : vector<1x8x8xi1> to vector<2x8x8xi1>
    %41 = vector.broadcast %cst_11 : f32 to vector<2x8x8xf32>
    %42 = arith.select %40, %38, %41 : vector<2x8x8xi1>, vector<2x8x8xf32>
    %cst_12 = arith.constant dense<0xFF800000> : vector<2x8xf32>
    %43 = vector.multi_reduction <maximumf>, %42, %cst_12 [2] : vector<2x8x8xf32> to vector<2x8xf32>
    %44 = vector.shape_cast %43 : vector<2x8xf32> to vector<2x8x1xf32>
    %45 = vector.broadcast %44 : vector<2x8x1xf32> to vector<2x8x8xf32>
    %46 = arith.subf %42, %45 : vector<2x8x8xf32>
    %47 = math.exp %46 : vector<2x8x8xf32>
    %cst_13 = arith.constant dense<0.000000e+00> : vector<2x8xf32>
    %48 = vector.multi_reduction <add>, %47, %cst_13 [2] : vector<2x8x8xf32> to vector<2x8xf32>
    %49 = vector.shape_cast %48 : vector<2x8xf32> to vector<2x8x1xf32>
    %50 = tpu.reciprocal %49 {approx = true} : vector<2x8x1xf32> -> vector<2x8x1xf32>
    %51 = vector.broadcast %50 : vector<2x8x1xf32> to vector<2x8x8xf32>
    %52 = arith.mulf %47, %51 : vector<2x8x8xf32>
    "tpu.trace_start"() <{level = 10 : i32, message = "bqk,bkd->bqd"}> : () -> ()
    %cst_14 = arith.constant dense<0.000000e+00> : vector<2x8x8xf32>
    %53 = tpu.matmul %52, %37, %cst_14 {dimension_numbers = #tpu.dot_dimension_numbers<[2], [1], [1], [2], [0, 0, 0, 1, 1, 2], [0], [0]>} : vector<2x8x8xf32>, vector<2x8x8xf32>, vector<2x8x8xf32> -> vector<2x8x8xf32>
    "tpu.trace_stop"() : () -> ()
    %54 = vector.extract_strided_slice %2 {offsets = [0, 16], sizes = [16, 8], strides = [1, 1]} : vector<16x96xf32> to vector<16x8xf32>
    %cst_15 = arith.constant 0.353553385 : f32
    %55 = vector.broadcast %cst_15 : f32 to vector<16x8xf32>
    %56 = arith.mulf %54, %55 : vector<16x8xf32>
    %57 = vector.shape_cast %56 : vector<16x8xf32> to vector<2x8x8xf32>
    %58 = vector.extract_strided_slice %2 {offsets = [0, 48], sizes = [16, 8], strides = [1, 1]} : vector<16x96xf32> to vector<16x8xf32>
    %59 = vector.shape_cast %58 : vector<16x8xf32> to vector<2x8x8xf32>
    %60 = vector.extract_strided_slice %2 {offsets = [0, 80], sizes = [16, 8], strides = [1, 1]} : vector<16x96xf32> to vector<16x8xf32>
    %61 = vector.shape_cast %60 : vector<16x8xf32> to vector<2x8x8xf32>
    "tpu.trace_start"() <{level = 10 : i32, message = "bqd,bkd->bqk"}> : () -> ()
    %cst_16 = arith.constant dense<0.000000e+00> : vector<2x8x8xf32>
    %62 = tpu.matmul %57, %59, %cst_16 {dimension_numbers = #tpu.dot_dimension_numbers<[2], [2], [1], [1], [0, 0, 0, 1, 1, 1], [0], [0]>} : vector<2x8x8xf32>, vector<2x8x8xf32>, vector<2x8x8xf32> -> vector<2x8x8xf32>
    %cst_17 = arith.constant 0xFF800000 : f32
    "tpu.trace_stop"() : () -> ()
    %63 = vector.shape_cast %5 : vector<8x8xi1> to vector<1x8x8xi1>
    %64 = vector.broadcast %63 : vector<1x8x8xi1> to vector<2x8x8xi1>
    %65 = vector.broadcast %cst_17 : f32 to vector<2x8x8xf32>
    %66 = arith.select %64, %62, %65 : vector<2x8x8xi1>, vector<2x8x8xf32>
    %cst_18 = arith.constant dense<0xFF800000> : vector<2x8xf32>
    %67 = vector.multi_reduction <maximumf>, %66, %cst_18 [2] : vector<2x8x8xf32> to vector<2x8xf32>
    %68 = vector.shape_cast %67 : vector<2x8xf32> to vector<2x8x1xf32>
    %69 = vector.broadcast %68 : vector<2x8x1xf32> to vector<2x8x8xf32>
    %70 = arith.subf %66, %69 : vector<2x8x8xf32>
    %71 = math.exp %70 : vector<2x8x8xf32>
    %cst_19 = arith.constant dense<0.000000e+00> : vector<2x8xf32>
    %72 = vector.multi_reduction <add>, %71, %cst_19 [2] : vector<2x8x8xf32> to vector<2x8xf32>
    %73 = vector.shape_cast %72 : vector<2x8xf32> to vector<2x8x1xf32>
    %74 = tpu.reciprocal %73 {approx = true} : vector<2x8x1xf32> -> vector<2x8x1xf32>
    %75 = vector.broadcast %74 : vector<2x8x1xf32> to vector<2x8x8xf32>
    %76 = arith.mulf %71, %75 : vector<2x8x8xf32>
    "tpu.trace_start"() <{level = 10 : i32, message = "bqk,bkd->bqd"}> : () -> ()
    %cst_20 = arith.constant dense<0.000000e+00> : vector<2x8x8xf32>
    %77 = tpu.matmul %76, %61, %cst_20 {dimension_numbers = #tpu.dot_dimension_numbers<[2], [1], [1], [2], [0, 0, 0, 1, 1, 2], [0], [0]>} : vector<2x8x8xf32>, vector<2x8x8xf32>, vector<2x8x8xf32> -> vector<2x8x8xf32>
    "tpu.trace_stop"() : () -> ()
    %78 = vector.extract_strided_slice %2 {offsets = [0, 24], sizes = [16, 8], strides = [1, 1]} : vector<16x96xf32> to vector<16x8xf32>
    %cst_21 = arith.constant 0.353553385 : f32
    %79 = vector.broadcast %cst_21 : f32 to vector<16x8xf32>
    %80 = arith.mulf %78, %79 : vector<16x8xf32>
    %81 = vector.shape_cast %80 : vector<16x8xf32> to vector<2x8x8xf32>
    %82 = vector.extract_strided_slice %2 {offsets = [0, 56], sizes = [16, 8], strides = [1, 1]} : vector<16x96xf32> to vector<16x8xf32>
    %83 = vector.shape_cast %82 : vector<16x8xf32> to vector<2x8x8xf32>
    %84 = vector.extract_strided_slice %2 {offsets = [0, 88], sizes = [16, 8], strides = [1, 1]} : vector<16x96xf32> to vector<16x8xf32>
    %85 = vector.shape_cast %84 : vector<16x8xf32> to vector<2x8x8xf32>
    "tpu.trace_start"() <{level = 10 : i32, message = "bqd,bkd->bqk"}> : () -> ()
    %cst_22 = arith.constant dense<0.000000e+00> : vector<2x8x8xf32>
    %86 = tpu.matmul %81, %83, %cst_22 {dimension_numbers = #tpu.dot_dimension_numbers<[2], [2], [1], [1], [0, 0, 0, 1, 1, 1], [0], [0]>} : vector<2x8x8xf32>, vector<2x8x8xf32>, vector<2x8x8xf32> -> vector<2x8x8xf32>
    %cst_23 = arith.constant 0xFF800000 : f32
    "tpu.trace_stop"() : () -> ()
    %87 = vector.shape_cast %5 : vector<8x8xi1> to vector<1x8x8xi1>
    %88 = vector.broadcast %87 : vector<1x8x8xi1> to vector<2x8x8xi1>
    %89 = vector.broadcast %cst_23 : f32 to vector<2x8x8xf32>
    %90 = arith.select %88, %86, %89 : vector<2x8x8xi1>, vector<2x8x8xf32>
    %cst_24 = arith.constant dense<0xFF800000> : vector<2x8xf32>
    %91 = vector.multi_reduction <maximumf>, %90, %cst_24 [2] : vector<2x8x8xf32> to vector<2x8xf32>
    %92 = vector.shape_cast %91 : vector<2x8xf32> to vector<2x8x1xf32>
    %93 = vector.broadcast %92 : vector<2x8x1xf32> to vector<2x8x8xf32>
    %94 = arith.subf %90, %93 : vector<2x8x8xf32>
    %95 = math.exp %94 : vector<2x8x8xf32>
    %cst_25 = arith.constant dense<0.000000e+00> : vector<2x8xf32>
    %96 = vector.multi_reduction <add>, %95, %cst_25 [2] : vector<2x8x8xf32> to vector<2x8xf32>
    %97 = vector.shape_cast %96 : vector<2x8xf32> to vector<2x8x1xf32>
    %98 = tpu.reciprocal %97 {approx = true} : vector<2x8x1xf32> -> vector<2x8x1xf32>
    %99 = vector.broadcast %98 : vector<2x8x1xf32> to vector<2x8x8xf32>
    %100 = arith.mulf %95, %99 : vector<2x8x8xf32>
    "tpu.trace_start"() <{level = 10 : i32, message = "bqk,bkd->bqd"}> : () -> ()
    %cst_26 = arith.constant dense<0.000000e+00> : vector<2x8x8xf32>
    %101 = tpu.matmul %100, %85, %cst_26 {dimension_numbers = #tpu.dot_dimension_numbers<[2], [1], [1], [2], [0, 0, 0, 1, 1, 2], [0], [0]>} : vector<2x8x8xf32>, vector<2x8x8xf32>, vector<2x8x8xf32> -> vector<2x8x8xf32>
    "tpu.trace_stop"() : () -> ()
    %102 = tpu.concatenate %29, %53, %77, %101 in 2 : vector<2x8x8xf32>, vector<2x8x8xf32>, vector<2x8x8xf32>, vector<2x8x8xf32> -> vector<2x8x32xf32>
    %103 = vector.shape_cast %102 : vector<2x8x32xf32> to vector<16x32xf32>
    %c0_27 = arith.constant 0 : index
    %c0_28 = arith.constant 0 : index
    %104 = vector.load %arg2[%c0_27, %c0_28] : memref<32x32xf32, #tpu.memory_space<vmem>>, vector<32x32xf32>
    %cst_29 = arith.constant dense<0.000000e+00> : vector<16x32xf32>
    %105 = tpu.matmul %103, %104, %cst_29 {dimension_numbers = #tpu.dot_dimension_numbers<[1], [0], [0], [1], [0, 0, 1, 1], [], []>} : vector<16x32xf32>, vector<32x32xf32>, vector<16x32xf32> -> vector<16x32xf32>
    %c0_30 = arith.constant 0 : index
    %c0_31 = arith.constant 0 : index
    %106 = vector.load %arg3[%c0_30, %c0_31] : memref<1x32xf32, #tpu.memory_space<vmem>>, vector<1x32xf32>
    %107 = vector.broadcast %106 : vector<1x32xf32> to vector<16x32xf32>
    %108 = arith.addf %105, %107 : vector<16x32xf32>
    %c0_32 = arith.constant 0 : index
    %c0_33 = arith.constant 0 : index
    %109 = vector.load %arg4[%c0_32, %c0_33] : memref<16x32xf32, #tpu.memory_space<vmem>>, vector<16x32xf32>
    tpu.vector_store %arg4[%c0_32, %c0_33], %108 {strides = array<i32>} : memref<16x32xf32, #tpu.memory_space<vmem>>, vector<16x32xf32>,
    return
  }
}

</mosaic_0001>

<bundles_post_ra>
// kernel: tpu_custom_call.1
= control target key start
LH: loop header
LB: loop body
LE: loop exit
PB: predicated region body
PF: predicated region fallthrough
CT: control target
= control target key end

     0   :  { %9 = vsyncpa [#allocation3], 0  ;;  %s2247_s0 = inlined_call_operand.hbm [shape: f32[16,32], index: 0, kind: input, shape index: {}]   ;;  %s2248_s1 = inlined_call_operand.hbm [shape: f32[32,96], index: 1, kind: input, shape index: {}]   ;;  %s2249_s2 = inlined_call_operand.hbm [shape: f32[32,32], index: 2, kind: input, shape index: {}]   ;;  %s2250_s3 = inlined_call_operand.vmem [shape: f32[1,32], index: 3, kind: input, shape index: {}]   ;;  %s2251_s4 = inlined_call_operand.hbm [shape: f32[16,32], index: 4, kind: output, shape index: {}]  }
   0x1   :  { %10 = vsyncpa [#allocation6], 0 }
   0x2   :  { %11 = vsyncpa [#allocation4], 0  ;;  %s1967_s15 = smov [#allocation5]   ;;  %s1968_s17 = smov [#allocation2]  }
   0x3   :  { %s29_s16 = sshll.u32 %s1967_s15, 4  ;;  %s17_s18 = sshll.u32 %s1968_s17, 4  ;;  %s30_s16 = int_to_ptr.vmem [resolvable:$true] %s29_s16  ;;  %s2013_s18 = int_to_ptr.vmem [resolvable:$true] %s17_s18 }
   0x4   :  { %s1873_s21 = scalar_lea.hbm %s2248_s1, 512 }
   0x5   :  { %p1874_p0 = scmp.ne.s32.totalorder %s2248_s1, %s1873_s21  ;;  %p1877_p1 = scmp.lt.u32.totalorder %s1873_s21, %s2248_s1 }
   0x7   :  { %p1879_p2 = pnand %p1877_p1, %p1874_p0 }
   0x9   :  { %1882 = shalt.err (!%p1879_p2)
}
   0xa   :  { %s1883_s26 = scalar_lea.vmem %s30_s16, 512  ;;  %p1888_p4 = scmp.lt.s32.totalorder %s30_s16, %s30_s16 }
   0xb   :  { %p1884_p3 = scmp.ne.s32.totalorder %s30_s16, %s1883_s26  ;;  %p1889_p5 = scmp.lt.s32.totalorder %s1883_s26, %s1883_s26 }
   0xd   :  { %p1890_p6 = por %p1889_p5, %p1888_p4 }
   0xf   :  { %p1891_p7 = pnand %p1890_p6, %p1884_p3 }
  0x11   :  { %1894 = shalt.err (!%p1891_p7)
}
  0x12   :  { %s1969_s27 = smov 128   ;;  %s1970_s28 = smov 8  }
  0x13   :  { %35 = dma.hbm_to_vmem [thread:$0]  %s2248_s1, 512, %s30_s16, [#allocation6], %s1969_s27, %s1969_s27, %s1970_s28  }
  0x14   :  { %s1895_s7 = scalar_lea.hbm %s2247_s0, 256 }
  0x15   :  { %p1896_p8 = scmp.ne.s32.totalorder %s2247_s0, %s1895_s7  ;;  %p1899_p9 = scmp.lt.u32.totalorder %s1895_s7, %s2247_s0 }
  0x17   :  { %p1901_p10 = pnand %p1899_p9, %p1896_p8 }
  0x19   :  { %1904 = shalt.err (!%p1901_p10)
}
  0x1a   :  { %s1905_s12 = scalar_lea.vmem %s2013_s18, 256  ;;  %p1910_p12 = scmp.lt.s32.totalorder %s2013_s18, %s2013_s18 }
  0x1b   :  { %p1906_p11 = scmp.ne.s32.totalorder %s2013_s18, %s1905_s12  ;;  %p1911_p13 = scmp.lt.s32.totalorder %s1905_s12, %s1905_s12 }
  0x1d   :  { %p1912_p0 = por %p1911_p13, %p1910_p12 }
  0x1f   :  { %p1913_p1 = pnand %p1912_p0, %p1906_p11 }
  0x21   :  { %1916 = shalt.err (!%p1913_p1)
}
  0x22   :  { %23 = dma.hbm_to_vmem [thread:$0]  %s2247_s0, 256, %s2013_s18, [#allocation3], %s1969_s27, %s1969_s27, %s1970_s28  }
  0x23   :  { %s1971_s14 = smov [#allocation7]   ;;  %s1917_s19 = scalar_lea.hbm %s2249_s2, 512 }
  0x24   :  { %s41_s15 = sshll.u32 %s1971_s14, 4  ;;  %p1918_p2 = scmp.ne.s32.totalorder %s2249_s2, %s1917_s19  ;;  %s42_s15 = int_to_ptr.vmem [resolvable:$true] %s41_s15 }
  0x25   :  { %p1921_p3 = scmp.lt.u32.totalorder %s1917_s19, %s2249_s2 }
  0x27   :  { %p1923_p4 = pnand %p1921_p3, %p1918_p2 }
  0x29   :  { %1926 = shalt.err (!%p1923_p4)
}
  0x2a   :  { %s1927_s24 = scalar_lea.vmem %s42_s15, 512  ;;  %p1932_p6 = scmp.lt.s32.totalorder %s42_s15, %s42_s15 }
  0x2b   :  { %p1928_p5 = scmp.ne.s32.totalorder %s42_s15, %s1927_s24  ;;  %p1933_p7 = scmp.lt.s32.totalorder %s1927_s24, %s1927_s24 }
  0x2d   :  { %p1934_p8 = por %p1933_p7, %p1932_p6 }
  0x2f   :  { %p1935_p9 = pnand %p1934_p8, %p1928_p5 }
  0x31   :  { %1938 = shalt.err (!%p1935_p9)
}
  0x32   :  { %47 = dma.hbm_to_vmem [thread:$0]  %s2249_s2, 512, %s42_s15, [#allocation6], %s1969_s27, %s1969_s27, %s1970_s28  }
  0x33   :  { %1961 = dma.done.wait [#allocation3], 256  }
  0x34   :  { %1962 = vsyncadd [#allocation3], 4294967040 }
  0x35   :  { %1963 = dma.done.wait [#allocation6], 1024  }
  0x36   :  { %1964 = vsyncadd [#allocation6], 4294966272  ;;  %vm65_vm0 = vcmask 261120   ;;  %v61_v0 = vld [vmem:[#allocation5] sm:$0xff]  ;;  %v62_v1 = vld [vmem:[#allocation5 + $0x8] sm:$0xff]  ;;  %v1972_v8 = vmov 0.0   ;;  %v147_v15 = vlaneseq }
  0x37   :  { %v63_v2 = vld [vmem:[#allocation5 + $0x10] sm:$0xff]  ;;  %v1804_v3 = vpack.c.bf16 %v62_v1, %v61_v0  ;;  %v64_v4 = vld [vmem:[#allocation5 + $0x18] sm:$0xff]  ;;  %1713 = vmatprep.subr.mxu1 %v1972_v8  ;;  %vm1973_vm1 = vmmov 0   ;;  %s1974_s2 = smov 96   ;;  %vm157_vm2 = vcmask 64512   ;;  %s1975_s25 = smov 64  }
  0x38   :  { %v59_v5 = vld [vmem:[#allocation2] sm:$0xff]  ;;  %v1808_v6 = vpack.c.bf16 %v64_v4, %v63_v2  ;;  %v60_v7 = vld [vmem:[#allocation2 + $0x8] sm:$0xff]  ;;  %1715 = vmatprep.mubr.msk.f32.mxu1 %vm1973_vm1, %v1972_v8  ;;  %v148_v16 = vshrl.u32 %v147_v15, 7  ;;  %v150_v17 = vand.u32 127, %v147_v15  ;;  %s1976_s26 = smov 88   ;;  %s1977_s29 = smov 120  }
  0x39   :  { %1710 = vmatprep.mubr.msk.f32.mxu0 %vm65_vm0, %v59_v5  ;;  %1805 = vmatprep.subr.bf16.mxu0 %v1804_v3  ;;  %s1978_s30 = smov 56   ;;  %s1979_s5 = smov 112   ;;  %vm1514_vm4 = vcmask 195584   ;;  %vm1511_vm5 = vcmask 130048  }
  0x3a   :  { %1807 = vmatpush3.bf16.msra.mxu0 %v1804_v3  ;;  %vm2097_vm3 = vcmp.ge.s32.totalorder %v148_v16, %v150_v17  ;;  %s1980_s6 = smov 80   ;;  %s1981_s7 = smov 48  }
  0x3b   :  { %1809 = vmatprep.subr.bf16.mxu0 %v1808_v6  ;;  %s1982_s8 = smov 72   ;;  %s1983_s9 = smov 104  }
  0x3c   :  { %s1984_s10 = smov 40   ;;  %s1985_s11 = smov 16  }
  0x3d   :  { %s1986_s12 = smov 24   ;;  %s1987_s14 = smov [#allocation8]  }
  0x3e   :  { %1811 = vmatpush3.bf16.msra.mxu0 %v1808_v6  ;;  %s1616_s15 = sshll.u32 %s1987_s14, 4  ;;  %s1617_s15 = int_to_ptr.vmem [resolvable:$true] %s1616_s15 }
  0x3f   :  { %1733 = vmatprep.subr.mxu0 %v1972_v8  ;;  %s1939_s16 = scalar_lea.vmem %s1617_s15, 256  ;;  %p1944_p11 = scmp.lt.s32.totalorder %s1617_s15, %s1617_s15 }
  0x40   :  { %p1940_p10 = scmp.ne.s32.totalorder %s1617_s15, %s1939_s16  ;;  %p1945_p12 = scmp.lt.s32.totalorder %s1939_s16, %s1939_s16 }
  0x41   :  { %1711 = vmatmul.mubr.msk.f32.vlgmr.msra.gmra.mrb[0].mxu0 %vm65_vm0, %v60_v7 }
  0x42   :  { %1735 = vmatprep.mubr.msk.f32.mxu0 %vm1973_vm1, %v1972_v8  ;;  %p1946_p13 = por %p1945_p12, %p1944_p11 }
  0x44   :  { %p1947_p0 = pnand %p1946_p13, %p1940_p10 }
 0x114   :  { %v2073_v9 = vpop.f32.mrb[0].mxu0 }
 0x115   :  { %v2075_v10 = vpop.f32.mrb[1].mxu0  ;;  %v2090_v14 = vmul.f32 0.35355338, %v2073_v9 }
 0x116   :  { %155 = vrot.lane.b32.xlu0 %v2075_v10, %s1974_s2  ;;  %v2082_v12 = vmul.f32 0.35355338, %v2075_v10 }
 0x11a   :  { %234 = vrot.lane.b32.xlu0 %v2073_v9, %s1974_s2 }
 0x188   :  { %v156_v11 = vpop.permute.xlu0 %155 }
 0x189   :  { %1714 = vmatpush3.xpose.msk.msra.mxu1 %vm157_vm2, %v156_v11 }
 0x18a   :  { %1718 = vmatprep.subr.mxu1 %v1972_v8 }
 0x18c   :  { %v235_v13 = vpop.permute.xlu0 %234  ;;  %1716 = vmatmul.mubr.msk.f32.vlgmr.msra.gmra.mrb[0].mxu1 %vm157_vm2, %v2082_v12 }
 0x18d   :  { %1719 = vmatpush3.xpose.msk.msra.mxu1 %vm157_vm2, %v235_v13  ;;  %1720 = vmatprep.mubr.msk.f32.mxu1 %vm1973_vm1, %v1972_v8 }
 0x18e   :  { %1723 = vmatprep.subr.mxu1 %v1972_v8 }
 0x190   :  { %1721 = vmatmul.mubr.msk.f32.vlgmr.msra.gmra.mrb[2].mxu1 %vm157_vm2, %v2090_v14 }
 0x191   :  { %1725 = vmatprep.mubr.msk.f32.mxu1 %vm1973_vm1, %v1972_v8 }
 0x25f   :  { %v229_v19 = vpop.f32.mrb[0].mxu1 }
 0x260   :  { %v313_v20 = vsel %vm2097_vm3, %v229_v19, -inf  ;;  %v1717_v21 = vpop.f32.mrb[1].mxu1 }
 0x261   :  { %v315_v22 = vsel %vm157_vm2, %v313_v20, -inf }
 0x262   :  { %316 = vmax.xlane.f32.xlu1 %v315_v22 }
 0x263   :  { %v307_v23 = vpop.f32.mrb[2].mxu1 }
 0x264   :  { %v314_v24 = vsel %vm2097_vm3, %v307_v23, -inf  ;;  %v1722_v25 = vpop.f32.mrb[3].mxu1 }
 0x265   :  { %v318_v26 = vsel %vm157_vm2, %v314_v24, -inf }
 0x266   :  { %319 = vmax.xlane.f32.xlu1 %v318_v26 }
 0x277   :  { %337 = vrot.lane.b32.xlu1 %v2075_v10, %s1975_s25 }
 0x27b   :  { %413 = vrot.lane.b32.xlu1 %v2073_v9, %s1975_s25 }
 0x27f   :  { %491 = vrot.lane.b32.xlu1 %v2075_v10, %s1976_s26 }
 0x283   :  { %569 = vrot.lane.b32.xlu1 %v2073_v9, %s1976_s26 }
 0x2ef   :  { %v317_v27 = vpop.xlane.xlu1 %316 }
 0x2f0   :  { %v321_v28 = vsub.f32 %v313_v20, %v317_v27 }
 0x2f2   :  { %v323_v29 = vmul.f32 1.442695, %v321_v28 }
 0x2f3   :  { %v320_v30 = vpop.xlane.xlu1 %319 }
 0x2f4   :  { %1841 = vpow2.f32 %v323_v29  ;;  %v322_v31 = vsub.f32 %v314_v24, %v320_v30 }
 0x2f6   :  { %v325_v32 = vmul.f32 1.442695, %v322_v31 }
 0x2f7   :  { %v338_v33 = vpop.permute.xlu1 %337 }
 0x2f8   :  { %1843 = vpow2.f32 %v325_v32  ;;  %1724 = vmatpush3.msra.mxu1 %v338_v33 }
 0x2f9   :  { %1728 = vmatprep.subr.mxu1 %v1972_v8 }
 0x2fb   :  { %v414_v34 = vpop.permute.xlu1 %413 }
 0x2fe   :  { %v1842_v35 = vpop.eup %1841 }
 0x2ff   :  { %v492_v36 = vpop.permute.xlu1 %491  ;;  %v327_v37 = vsel %vm157_vm2, %v1842_v35, 0.0 }
 0x300   :  { %328 = vadd.xlane.f32.xlu0 %v327_v37  ;;  %1734 = vmatpush3.xpose.msk.msra.mxu0 %vm157_vm2, %v492_v36 }
 0x301   :  { %1743 = vmatprep.subr.mxu0 %v1972_v8 }
 0x302   :  { %v1844_v38 = vpop.eup %1843 }
 0x303   :  { %v330_v39 = vsel %vm157_vm2, %v1844_v38, 0.0  ;;  %v570_v40 = vpop.permute.xlu1 %569 }
 0x304   :  { %331 = vadd.xlane.f32.xlu1 %v330_v39 }
 0x315   :  { %567 = vrot.lane.b32.xlu1 %v2090_v14, %s1977_s29 }
 0x316   :  { %489 = vrot.lane.b32.xlu0 %v2082_v12, %s1977_s29 }
 0x38d   :  { %v329_v41 = vpop.xlane.xlu0 %328 }
 0x38e   :  { %1845 = vrcp.f32 %v329_v41 }
 0x391   :  { %v490_v42 = vpop.permute.xlu0 %489  ;;  %v332_v43 = vpop.xlane.xlu1 %331 }
 0x392   :  { %1847 = vrcp.f32 %v332_v43  ;;  %1736 = vmatmul.mubr.msk.f32.vlgmr.msra.gmra.mrb[2].mxu0 %vm157_vm2, %v490_v42 }
 0x393   :  { %1745 = vmatprep.mubr.msk.f32.mxu0 %vm1973_vm1, %v1972_v8 }
 0x395   :  { %v568_v48 = vpop.permute.xlu1 %567 }
 0x398   :  { %v1846_v44 = vpop.eup %1845 }
 0x399   :  { %v335_v45 = vmul.f32 %v1846_v44, %v1842_v35 }
 0x39b   :  { %1726 = vmatmul.mubr.msk.f32.vlgmr.msra.gmra.mrb[4].mxu1 %vm157_vm2, %v335_v45 }
 0x39c   :  { %v1848_v46 = vpop.eup %1847  ;;  %1729 = vmatpush3.msra.mxu1 %v414_v34  ;;  %1730 = vmatprep.mubr.msk.f32.mxu1 %vm1973_vm1, %v1972_v8 }
 0x39d   :  { %v336_v47 = vmul.f32 %v1848_v46, %v1844_v38  ;;  %1738 = vmatprep.subr.mxu1 %v1972_v8 }
 0x39f   :  { %1731 = vmatmul.mubr.msk.f32.vlgmr.msra.gmra.mrb[6].mxu1 %vm157_vm2, %v336_v47 }
 0x3a0   :  { %1740 = vmatprep.mubr.msk.f32.mxu1 %vm1973_vm1, %v1972_v8 }
 0x3a3   :  { %1739 = vmatpush3.xpose.msk.msra.mxu1 %vm157_vm2, %v570_v40 }
 0x3a4   :  { %1748 = vmatprep.subr.mxu1 %v1972_v8 }
 0x3a6   :  { %1741 = vmatmul.mubr.msk.f32.vlgmr.msra.gmra.mrb[8].mxu1 %vm157_vm2, %v568_v48 }
 0x3a7   :  { %1750 = vmatprep.mubr.msk.f32.mxu1 %vm1973_vm1, %v1972_v8 }
 0x465   :  { %v563_v49 = vpop.f32.mrb[2].mxu0 }
 0x466   :  { %v645_v50 = vsel %vm2097_vm3, %v563_v49, -inf  ;;  %v1737_v51 = vpop.f32.mrb[3].mxu0 }
 0x467   :  { %v647_v52 = vsel %vm157_vm2, %v645_v50, -inf }
 0x468   :  { %648 = vmax.xlane.f32.xlu1 %v647_v52 }
 0x46e   :  { %v2136_v53 = vpop.f32.mrb[4].mxu1 }
 0x46f   :  { %v1727_v54 = vpop.f32.mrb[5].mxu1 }
 0x472   :  { %v2138_v55 = vpop.f32.mrb[6].mxu1 }
 0x473   :  { %v1732_v56 = vpop.f32.mrb[7].mxu1 }
 0x479   :  { %v641_v57 = vpop.f32.mrb[8].mxu1 }
 0x47a   :  { %v646_v58 = vsel %vm2097_vm3, %v641_v57, -inf  ;;  %v1742_v59 = vpop.f32.mrb[9].mxu1 }
 0x47b   :  { %v650_v60 = vsel %vm157_vm2, %v646_v58, -inf }
 0x47c   :  { %651 = vmax.xlane.f32.xlu0 %v650_v60 }
 0x492   :  { %745 = vrot.lane.b32.xlu0 %v2073_v9, %s1978_s30 }
 0x496   :  { %821 = vrot.lane.b32.xlu0 %v2082_v12, %s1979_s5 }
 0x4f5   :  { %v649_v61 = vpop.xlane.xlu1 %648 }
 0x4f6   :  { %v653_v62 = vsub.f32 %v645_v50, %v649_v61 }
 0x4f8   :  { %v655_v63 = vmul.f32 1.442695, %v653_v62 }
 0x4fa   :  { %1849 = vpow2.f32 %v655_v63 }
 0x504   :  { %v1850_v0 = vpop.eup %1849 }
 0x505   :  { %v659_v1 = vsel %vm157_vm2, %v1850_v0, 0.0 }
 0x506   :  { %660 = vadd.xlane.f32.xlu1 %v659_v1 }
 0x509   :  { %v652_v2 = vpop.xlane.xlu0 %651 }
 0x50a   :  { %v654_v4 = vsub.f32 %v646_v58, %v652_v2 }
 0x50c   :  { %v657_v5 = vmul.f32 1.442695, %v654_v4 }
 0x50d   :  { %v746_v3 = vpop.permute.xlu0 %745 }
 0x50e   :  { %1749 = vmatpush3.msra.mxu1 %v746_v3  ;;  %1851 = vpow2.f32 %v657_v5 }
 0x50f   :  { %1758 = vmatprep.subr.mxu1 %v1972_v8 }
 0x511   :  { %v822_v19 = vpop.permute.xlu0 %821 }
 0x517   :  { %669 = vrot.lane.b32.xlu1 %v2075_v10, %s1978_s30 }
 0x518   :  { %v1852_v6 = vpop.eup %1851 }
 0x519   :  { %v662_v7 = vsel %vm157_vm2, %v1852_v6, 0.0 }
 0x51b   :  { %823 = vrot.lane.b32.xlu1 %v2075_v10, %s1980_s6 }
 0x51f   :  { %901 = vrot.lane.b32.xlu1 %v2073_v9, %s1980_s6 }
 0x543   :  { %663 = vadd.xlane.f32.xlu1 %v662_v7 }
 0x554   :  { %899 = vrot.lane.b32.xlu1 %v2090_v14, %s1979_s5 }
 0x593   :  { %v661_v11 = vpop.xlane.xlu1 %660 }
 0x594   :  { %1853 = vrcp.f32 %v661_v11 }
 0x597   :  { %v670_v13 = vpop.permute.xlu1 %669 }
 0x598   :  { %1744 = vmatpush3.msra.mxu0 %v670_v13 }
 0x599   :  { %1753 = vmatprep.subr.mxu0 %v1972_v8 }
 0x59b   :  { %v824_v17 = vpop.permute.xlu1 %823 }
 0x59e   :  { %v1854_v15 = vpop.eup %1853 }
 0x59f   :  { %v667_v16 = vmul.f32 %v1854_v15, %v1850_v0  ;;  %v902_v20 = vpop.permute.xlu1 %901 }
 0x5a1   :  { %1746 = vmatmul.mubr.msk.f32.vlgmr.msra.gmra.mrb[4].mxu0 %vm157_vm2, %v667_v16 }
 0x5a2   :  { %1754 = vmatpush3.xpose.msk.msra.mxu0 %vm157_vm2, %v824_v17  ;;  %1755 = vmatprep.mubr.msk.f32.mxu0 %vm1973_vm1, %v1972_v8 }
 0x5a3   :  { %1763 = vmatprep.subr.mxu0 %v1972_v8 }
 0x5a5   :  { %1756 = vmatmul.mubr.msk.f32.vlgmr.msra.gmra.mrb[6].mxu0 %vm157_vm2, %v822_v19 }
 0x5a6   :  { %1765 = vmatprep.mubr.msk.f32.mxu0 %vm1973_vm1, %v1972_v8 }
 0x5d0   :  { %v664_v21 = vpop.xlane.xlu1 %663 }
 0x5d1   :  { %1855 = vrcp.f32 %v664_v21 }
 0x5d4   :  { %v900_v24 = vpop.permute.xlu1 %899 }
 0x5db   :  { %v1856_v22 = vpop.eup %1855 }
 0x5dc   :  { %v668_v23 = vmul.f32 %v1856_v22, %v1852_v6 }
 0x5de   :  { %1751 = vmatmul.mubr.msk.f32.vlgmr.msra.gmra.mrb[10].mxu1 %vm157_vm2, %v668_v23 }
 0x5df   :  { %1759 = vmatpush3.xpose.msk.msra.mxu1 %vm157_vm2, %v902_v20  ;;  %1760 = vmatprep.mubr.msk.f32.mxu1 %vm1973_vm1, %v1972_v8 }
 0x5e0   :  { %1768 = vmatprep.subr.mxu1 %v1972_v8 }
 0x5e2   :  { %1761 = vmatmul.mubr.msk.f32.vlgmr.msra.gmra.mrb[12].mxu1 %vm157_vm2, %v900_v24 }
 0x5e3   :  { %1770 = vmatprep.mubr.msk.f32.mxu1 %vm1973_vm1, %v1972_v8 }
 0x674   :  { %v2169_v25 = vpop.f32.mrb[4].mxu0 }
 0x675   :  { %v1747_v26 = vpop.f32.mrb[5].mxu0 }
 0x678   :  { %v895_v27 = vpop.f32.mrb[6].mxu0 }
 0x679   :  { %v977_v28 = vsel %vm2097_vm3, %v895_v27, -inf  ;;  %v1757_v29 = vpop.f32.mrb[7].mxu0 }
 0x67a   :  { %v979_v30 = vsel %vm157_vm2, %v977_v28, -inf  ;;  %v1518_v29 = vld [vmem:[#allocation7 + $0x8] sm:$0xff] }
 0x67b   :  { %980 = vmax.xlane.f32.xlu0 %v979_v30  ;;  %v1519_v30 = vld [vmem:[#allocation7 + $0x10] sm:$0xff] }
 0x6b1   :  { %v2174_v31 = vpop.f32.mrb[10].mxu1 }
 0x6b2   :  { %v1752_v32 = vpop.f32.mrb[11].mxu1 }
 0x6b5   :  { %v973_v33 = vpop.f32.mrb[12].mxu1 }
 0x6b6   :  { %v978_v34 = vsel %vm2097_vm3, %v973_v33, -inf  ;;  %v1762_v35 = vpop.f32.mrb[13].mxu1 }
 0x6b7   :  { %v982_v36 = vsel %vm157_vm2, %v978_v34, -inf }
 0x6b8   :  { %983 = vmax.xlane.f32.xlu1 %v982_v36 }
 0x6c9   :  { %1001 = vrot.lane.b32.xlu1 %v2075_v10, %s1981_s7 }
 0x6cd   :  { %1155 = vrot.lane.b32.xlu1 %v2075_v10, %s1982_s8 }
 0x6d1   :  { %1233 = vrot.lane.b32.xlu1 %v2073_v9, %s1982_s8 }
 0x6d5   :  { %1231 = vrot.lane.b32.xlu1 %v2090_v14, %s1983_s9 }
 0x708   :  { %v981_v37 = vpop.xlane.xlu0 %980 }
 0x709   :  { %v985_v38 = vsub.f32 %v977_v28, %v981_v37  ;;  %v1517_v28 = vld [vmem:[#allocation7] sm:$0xff] }
 0x70b   :  { %v987_v39 = vmul.f32 1.442695, %v985_v38 }
 0x70d   :  { %1857 = vpow2.f32 %v987_v39 }
 0x717   :  { %v1858_v40 = vpop.eup %1857 }
 0x718   :  { %v991_v41 = vsel %vm157_vm2, %v1858_v40, 0.0 }
 0x719   :  { %992 = vadd.xlane.f32.xlu0 %v991_v41 }
 0x72f   :  { %1077 = vrot.lane.b32.xlu0 %v2073_v9, %s1981_s7 }
 0x745   :  { %v984_v42 = vpop.xlane.xlu1 %983 }
 0x746   :  { %v986_v43 = vsub.f32 %v978_v34, %v984_v42 }
 0x748   :  { %v989_v44 = vmul.f32 1.442695, %v986_v43 }
 0x749   :  { %v1002_v45 = vpop.permute.xlu1 %1001 }
 0x74a   :  { %1859 = vpow2.f32 %v989_v44  ;;  %1764 = vmatpush3.msra.mxu0 %v1002_v45 }
 0x74b   :  { %1773 = vmatprep.subr.mxu0 %v1972_v8 }
 0x74d   :  { %v1156_v51 = vpop.permute.xlu1 %1155 }
 0x751   :  { %v1234_v56 = vpop.permute.xlu1 %1233 }
 0x754   :  { %v1860_v46 = vpop.eup %1859 }
 0x755   :  { %v994_v14 = vsel %vm157_vm2, %v1860_v46, 0.0  ;;  %v1232_v58 = vpop.permute.xlu1 %1231 }
 0x756   :  { %995 = vadd.xlane.f32.xlu0 %v994_v14 }
 0x76c   :  { %1153 = vrot.lane.b32.xlu0 %v2082_v12, %s1983_s9 }
 0x7a6   :  { %v993_v47 = vpop.xlane.xlu0 %992 }
 0x7a7   :  { %1861 = vrcp.f32 %v993_v47 }
 0x7aa   :  { %v1078_v48 = vpop.permute.xlu0 %1077 }
 0x7ab   :  { %1769 = vmatpush3.msra.mxu1 %v1078_v48 }
 0x7ac   :  { %1778 = vmatprep.subr.mxu1 %v1972_v8 }
 0x7b1   :  { %v1862_v49 = vpop.eup %1861 }
 0x7b2   :  { %v999_v50 = vmul.f32 %v1862_v49, %v1858_v40 }
 0x7b4   :  { %1766 = vmatmul.mubr.msk.f32.vlgmr.msra.gmra.mrb[8].mxu0 %vm157_vm2, %v999_v50 }
 0x7b5   :  { %1774 = vmatpush3.xpose.msk.msra.mxu0 %vm157_vm2, %v1156_v51  ;;  %1775 = vmatprep.mubr.msk.f32.mxu0 %vm1973_vm1, %v1972_v8 }
 0x7b6   :  { %1783 = vmatprep.subr.mxu0 %v1972_v8 }
 0x7e3   :  { %v996_v52 = vpop.xlane.xlu0 %995 }
 0x7e4   :  { %1863 = vrcp.f32 %v996_v52 }
 0x7e7   :  { %v1154_v12 = vpop.permute.xlu0 %1153 }
 0x7e8   :  { %1776 = vmatmul.mubr.msk.f32.vlgmr.msra.gmra.mrb[10].mxu0 %vm157_vm2, %v1154_v12 }
 0x7e9   :  { %1785 = vmatprep.mubr.msk.f32.mxu0 %vm1973_vm1, %v1972_v8 }
 0x7ee   :  { %v1864_v54 = vpop.eup %1863 }
 0x7ef   :  { %v1000_v57 = vmul.f32 %v1864_v54, %v1860_v46 }
 0x7f1   :  { %1771 = vmatmul.mubr.msk.f32.vlgmr.msra.gmra.mrb[14].mxu1 %vm157_vm2, %v1000_v57 }
 0x7f2   :  { %1779 = vmatpush3.xpose.msk.msra.mxu1 %vm157_vm2, %v1234_v56  ;;  %1780 = vmatprep.mubr.msk.f32.mxu1 %vm1973_vm1, %v1972_v8 }
 0x7f3   :  { %1788 = vmatprep.subr.mxu1 %v1972_v8 }
 0x7f5   :  { %1781 = vmatmul.mubr.msk.f32.vlgmr.msra.gmra.mrb[16].mxu1 %vm157_vm2, %v1232_v58 }
 0x7f6   :  { %1790 = vmatprep.mubr.msk.f32.mxu1 %vm1973_vm1, %v1972_v8 }
 0x887   :  { %v1073_v59 = vpop.f32.mrb[8].mxu0 }
 0x888   :  { %v1767_v60 = vpop.f32.mrb[9].mxu0 }
 0x8bb   :  { %v1227_v61 = vpop.f32.mrb[10].mxu0 }
 0x8bc   :  { %v1309_v62 = vsel %vm2097_vm3, %v1227_v61, -inf  ;;  %v1777_v63 = vpop.f32.mrb[11].mxu0 }
 0x8bd   :  { %v1311_v0 = vsel %vm157_vm2, %v1309_v62, -inf }
 0x8be   :  { %1312 = vmax.xlane.f32.xlu0 %v1311_v0 }
 0x8c4   :  { %v1149_v1 = vpop.f32.mrb[14].mxu1 }
 0x8c5   :  { %v1772_v2 = vpop.f32.mrb[15].mxu1 }
 0x8c8   :  { %v1305_v3 = vpop.f32.mrb[16].mxu1 }
 0x8c9   :  { %v1310_v4 = vsel %vm2097_vm3, %v1305_v3, -inf  ;;  %v1782_v5 = vpop.f32.mrb[17].mxu1 }
 0x8ca   :  { %v1314_v6 = vsel %vm157_vm2, %v1310_v4, -inf }
 0x8cb   :  { %1315 = vmax.xlane.f32.xlu1 %v1314_v6 }
 0x8dc   :  { %1333 = vrot.lane.b32.xlu1 %v2075_v10, %s1984_s10 }
 0x8e0   :  { %1487 = vrot.lane.b32.xlu1 %v2169_v25, %s1970_s28 }
 0x8e4   :  { %1489 = vrot.lane.b32.xlu1 %v2174_v31, %s1970_s28  ;;  %v1812_v31 = vpack.c.bf16 %v1518_v29, %v1517_v28 }
 0x8e8   :  { %1497 = vrot.lane.b32.xlu1 %v1149_v1, %s1985_s11 }
 0x94b   :  { %v1313_v8 = vpop.xlane.xlu0 %1312 }
 0x94c   :  { %v1317_v7 = vsub.f32 %v1309_v62, %v1313_v8 }
 0x94e   :  { %v1319_v11 = vmul.f32 1.442695, %v1317_v7 }
 0x950   :  { %1865 = vpow2.f32 %v1319_v11 }
 0x958   :  { %v1316_v18 = vpop.xlane.xlu1 %1315 }
 0x959   :  { %v1318_v13 = vsub.f32 %v1310_v4, %v1316_v18 }
 0x95a   :  { %v1866_v15 = vpop.eup %1865 }
 0x95b   :  { %v1321_v16 = vmul.f32 1.442695, %v1318_v13  ;;  %v1323_v17 = vsel %vm157_vm2, %v1866_v15, 0.0 }
 0x95c   :  { %1324 = vadd.xlane.f32.xlu0 %v1323_v17  ;;  %v1334_v10 = vpop.permute.xlu1 %1333 }
 0x95d   :  { %1867 = vpow2.f32 %v1321_v16  ;;  %1784 = vmatpush3.msra.mxu0 %v1334_v10 }
 0x95e   :  { %1813 = vmatprep.subr.bf16.mxu0 %v1812_v31 }
 0x960   :  { %v1488_v37 = vpop.permute.xlu1 %1487 }
 0x961   :  { %v1509_v39 = vsel %vm157_vm2, %v2136_v53, %v1488_v37  ;;  %v1655_v53 = vld [vmem:[%s2250_s3] ss:$0 sm:$0xff] }
 0x964   :  { %v1490_v43 = vpop.permute.xlu1 %1489 }
 0x965   :  { %v1510_v45 = vsel %vm157_vm2, %v2138_v55, %v1490_v43 }
 0x967   :  { %v1868_v19 = vpop.eup %1867 }
 0x968   :  { %v1326_v20 = vsel %vm157_vm2, %v1868_v19, 0.0  ;;  %v1498_v44 = vpop.permute.xlu1 %1497 }
 0x969   :  { %1327 = vadd.xlane.f32.xlu0 %v1326_v20  ;;  %v1513_v46 = vsel %vm1511_vm5, %v1510_v45, %v1498_v44 }
 0x97f   :  { %1409 = vrot.lane.b32.xlu0 %v2073_v9, %s1984_s10  ;;  %v1520_v9 = vld [vmem:[#allocation7 + $0x18] sm:$0xff] }
 0x980   :  { %v1816_v32 = vpack.c.bf16 %v1520_v9, %v1519_v30 }
 0x983   :  { %1495 = vrot.lane.b32.xlu0 %v1073_v59, %s1985_s11 }
 0x9e9   :  { %v1325_v21 = vpop.xlane.xlu0 %1324 }
 0x9ea   :  { %1869 = vrcp.f32 %v1325_v21 }
 0x9f4   :  { %v1870_v22 = vpop.eup %1869 }
 0x9f5   :  { %v1331_v23 = vmul.f32 %v1870_v22, %v1866_v15 }
 0x9f6   :  { %v1328_v24 = vpop.xlane.xlu0 %1327 }
 0x9f7   :  { %1871 = vrcp.f32 %v1328_v24  ;;  %1786 = vmatmul.mubr.msk.f32.vlgmr.msra.gmra.mrb[12].mxu0 %vm157_vm2, %v1331_v23 }
 0x9f8   :  { %1815 = vmatpush3.bf16.msra.mxu0 %v1812_v31 }
 0x9f9   :  { %1817 = vmatprep.subr.bf16.mxu0 %v1816_v32 }
 0x9fa   :  { %v1410_v25 = vpop.permute.xlu0 %1409 }
 0x9fb   :  { %1789 = vmatpush3.msra.mxu1 %v1410_v25 }
 0x9fc   :  { %1819 = vmatpush3.bf16.msra.mxu0 %v1816_v32 }
 0x9fe   :  { %v1496_v38 = vpop.permute.xlu0 %1495 }
 0x9ff   :  { %v1512_v40 = vsel %vm1511_vm5, %v1509_v39, %v1496_v38 }
 0xa01   :  { %v1872_v26 = vpop.eup %1871 }
 0xa02   :  { %v1332_v27 = vmul.f32 %v1872_v26, %v1868_v19 }
 0xa04   :  { %1791 = vmatmul.mubr.msk.f32.vlgmr.msra.gmra.mrb[18].mxu1 %vm157_vm2, %v1332_v27 }
 0xaca   :  { %v1405_v33 = vpop.f32.mrb[12].mxu0 }
 0xacb   :  { %1503 = vrot.lane.b32.xlu0 %v1405_v33, %s1986_s12  ;;  %v1787_v34 = vpop.f32.mrb[13].mxu0 }
 0xad7   :  { %v1481_v35 = vpop.f32.mrb[18].mxu1 }
 0xad8   :  { %1505 = vrot.lane.b32.xlu1 %v1481_v35, %s1986_s12  ;;  %v1792_v36 = vpop.f32.mrb[19].mxu1 }
 0xb3d   :  { %v1504_v41 = vpop.permute.xlu0 %1503 }
 0xb3e   :  { %v1515_v42 = vsel %vm1514_vm4, %v1512_v40, %v1504_v41 }
 0xb3f   :  { %1801 = vmatprep.mubr.msk.f32.mxu0 %vm65_vm0, %v1515_v42 }
 0xb4a   :  { %v1506_v14 = vpop.permute.xlu1 %1505 }
 0xb4b   :  { %v1516_v47 = vsel %vm1514_vm4, %v1513_v46, %v1506_v14 }
 0xb4c   :  { %1802 = vmatmul.mubr.msk.f32.vlgmr.msra.gmra.mrb[14].mxu0 %vm65_vm0, %v1516_v47 }
 0xc1f   :  { %v1803_v48 = vpop.f32.mrb[14].mxu0 }
 0xc20   :  { %v1606_v49 = vadd.f32 %v1803_v48, %v1655_v53  ;;  %v1600_v50 = vpop.f32.mrb[15].mxu0 }
 0xc21   :  { %v1601_v51 = vadd.f32 %v1655_v53, %v1600_v50 }
 0xc22   :  { %1610 = vst.msk [vmem:[#allocation8 + $0x8] sm:$0xff] %vm65_vm0, %v1606_v49 }
 0xc23   :  { %1609 = vst.msk [vmem:[#allocation8] sm:$0xff] %vm65_vm0, %v1601_v51 }
 0xc24   :  { %1950 = shalt.err (!%p1947_p0)
}
 0xc25   :  { %s1951_s19 = scalar_lea.hbm %s2251_s4, 256 }
 0xc26   :  { %p1952_p1 = scmp.ne.s32.totalorder %s2251_s4, %s1951_s19  ;;  %p1955_p2 = scmp.lt.u32.totalorder %s1951_s19, %s2251_s4 }
 0xc28   :  { %p1957_p3 = pnand %p1955_p2, %p1952_p1 }
 0xc2a   :  { %1960 = shalt.err (!%p1957_p3)
}
 0xc2b   :  { %1622 = dma.vmem_to_hbm [thread:$0]  %s1617_s15, 256, %s2251_s4, [#allocation4], %s1969_s27, %s1969_s27, %s1970_s28  }
 0xc2c   :  { %1965 = dma.done.wait [#allocation4], 256  }
 0xc2d   :  { %1966 = vsyncadd [#allocation4], 4294967040 }
 0xc2e   :  { %1626 = vsyncpa [#allocation3], 1 }
 0xc2f   :  { %1627 = vsyncpa [#allocation6], 1 }
 0xc30   :  { %1628 = vsyncpa [#allocation4], 1 }

</bundles_post_ra>
